<compile_context>
chip_gen: v7x
topology: tpu7x:2x2x1
jax: 0.10.0
libtpu: 0.0.40
codegen_flags: <defaults>
</compile_context>

<pallas_src>
import functools

import jax
import jax.numpy as jnp
from jax.experimental import pallas as pl
from jax.experimental.pallas import tpu as pltpu


def _round_up(x, m):
    return (x + m - 1) // m * m


def scaled_cheb_laplacian(adj):
    """L_hat = -D^{-1/2} A D^{-1/2} (zero diagonal): torch_geometric ChebConv with
    symmetric normalization and its default lambda_max = 2.0."""
    deg = jnp.sum(adj, axis=1)
    dinv_sqrt = jnp.where(deg > 0, 1.0 / jnp.sqrt(deg), 0.0)
    return -(dinv_sqrt[:, None] * adj * dinv_sqrt[None, :])


def _critic_kernel(xT_ref, lhatT_ref, w_ref, b_ref, wf_ref, bf_ref,   # inputs
                   out_ref,                                            # output
                   txs_ref, acc_ref,                                   # scratch
                   *, f_pad, tile_n, lhat_resident):
    s = pl.program_id(0)                  # recurrence sweep: produces Tx_{s+1}
    i = pl.program_id(1)                  # node (output-column) tile
    j = pl.program_id(2)                  # contraction tile (innermost)
    last_s = pl.num_programs(0) - 1
    last_j = pl.num_programs(2) - 1

    jcol = pl.multiple_of(j * tile_n, tile_n)
    icol = pl.multiple_of(i * tile_n, tile_n)

    # Seed Tx_0^T (= x^T) column block j during the very first row sweep (s==0, i==0).
    # j is innermost, so every block is written before any later step reads it, and the
    # write below happens before this very step's own read of the same block.
    @pl.when((s == 0) & (i == 0))
    def _():
        txs_ref[pl.ds(0, f_pad), pl.ds(jcol, tile_n)] = xT_ref[:, pl.ds(jcol, tile_n)]

    # New contraction sweep for this (s, i): clear the f32 accumulator and the output
    # block (keeps every HBM writeback of the revisited output block deterministic).
    @pl.when(j == 0)
    def _():
        acc_ref[...] = jnp.zeros_like(acc_ref)
        out_ref[...] = jnp.zeros_like(out_ref)

    # acc(F, i-cols) += Tx_s^T[:, j-cols] @ L_hat^T[j-rows, i-cols]   (bf16 MXU, f32 acc)
    src = pl.multiple_of(s * f_pad, f_pad)
    tx_cols = txs_ref[pl.ds(src, f_pad), pl.ds(jcol, tile_n)].astype(jnp.bfloat16)
    if lhat_resident:
        lhat_tile = lhatT_ref[pl.ds(jcol, tile_n), pl.ds(icol, tile_n)]
    else:
        lhat_tile = lhatT_ref[...]
    acc_ref[...] += jnp.dot(tx_cols, lhat_tile, preferred_element_type=jnp.float32)

    @pl.when(j == last_j)
    def _():
        # Chebyshev recurrence finalize for this node tile:
        #   Tx_1 = L_hat @ Tx_0 ,   Tx_{s+1} = 2 * L_hat @ Tx_s - Tx_{s-1}   (s >= 1)
        scale = jnp.where(s == 0, 1.0, 2.0)
        coeff = jnp.where(s == 0, 0.0, 1.0)
        prev = pl.multiple_of(jnp.maximum(s - 1, 0) * f_pad, f_pad)
        tx_new = (scale * acc_ref[...]
                  - coeff * txs_ref[pl.ds(prev, f_pad), pl.ds(icol, tile_n)])
        dst = pl.multiple_of((s + 1) * f_pad, f_pad)
        txs_ref[pl.ds(dst, f_pad), pl.ds(icol, tile_n)] = tx_new

        # Last sweep: the full transposed basis [Tx_0^T .. Tx_{K-1}^T] for this node tile
        # is one contiguous slice -> fused feature matmul, tanh, final Linear(H, 1).
        @pl.when(s == last_s)
        def _():
            basis_t = txs_ref[:, pl.ds(icol, tile_n)]                 # (K*F_pad, tile_n)
            h_t = jnp.tanh(jnp.dot(w_ref[...], basis_t,
                                   preferred_element_type=jnp.float32)
                           + b_ref[...])                               # (H_pad, tile_n)
            # Final Linear(H, 1): VPU multiply + sublane reduce, lane-dense (1, tile_n) store.
            y = jnp.sum(h_t * wf_ref[...], axis=0, keepdims=True) + bf_ref[0, 0]
            out_ref[...] = y


@functools.partial(jax.jit, static_argnames=("tile_n",))
def critic_forward(features, adj, w_cheb, b_cheb, w_final, b_final, *, tile_n=512):
    """Forward of Critic: self.final(tanh(ChebConv(features, adj))).view(-1)."""
    x = features.astype(jnp.float32)
    N, F = x.shape
    K, Fw, H = w_cheb.shape
    assert Fw == F, "w_cheb feature dim mismatch"

    # K == 1 has no recurrence sweep; pad with a zero-weight order so the grid stays
    # non-empty while leaving the result unchanged.
    if K == 1:
        w_cheb = jnp.concatenate([w_cheb, jnp.zeros_like(w_cheb)], axis=0)
        K = 2

    # Tile size: multiple of 128, no larger than the padded node count.
    tile_n = max(128, min(int(tile_n), _round_up(N, 128)))
    tile_n = (tile_n // 128) * 128
    n_pad = _round_up(N, tile_n)
    n_tiles = n_pad // tile_n

    f_pad = _round_up(F, 8)
    h_pad = _round_up(H, 8)

    lhat = scaled_cheb_laplacian(adj.astype(jnp.float32))
    lhat = jnp.pad(lhat, ((0, n_pad - N), (0, n_pad - N)))
    # The kernel consumes L_hat^T tiles (Tx^T @ L_hat^T), so feed the transpose; for the
    # usual symmetric adjacency this is the same data.  bf16 halves the dominant HBM stream.
    lhatT_bf16 = lhat.T.astype(jnp.bfloat16)

    # x^T with the node axis on lanes (lane-dense, no padding waste).
    xT = jnp.pad(x, ((0, n_pad - N), (0, f_pad - F))).T                 # (f_pad, n_pad)

    # Fused, transposed Chebyshev weights: wT[h, k*f_pad + f] = W[k, f, h].
    w_p = jnp.pad(w_cheb.astype(jnp.float32), ((0, 0), (0, f_pad - F), (0, 0)))
    wT = jnp.pad(w_p.reshape(K * f_pad, H).T, ((0, h_pad - H), (0, 0)))  # (h_pad, K*f_pad)
    b_col = jnp.pad(b_cheb.astype(jnp.float32).reshape(H, 1),
                    ((0, h_pad - H), (0, 0)))                            # (h_pad, 1)
    wf_col = jnp.pad(w_final.astype(jnp.float32).reshape(H, 1),
                     ((0, h_pad - H), (0, 0)))                           # (h_pad, 1)
    bf_scalar = b_final.reshape(1, 1).astype(jnp.float32)                # scalar -> SMEM

    # --- VMEM budget: decide L_hat residency and derive vmem_limit_bytes -------------
    txs_bytes = K * f_pad * n_pad * 4
    acc_bytes = f_pad * tile_n * 4
    xT_bytes = 2 * f_pad * n_pad * 4                  # conservative: 2 buffers
    lhat_res_bytes = 2 * n_pad * n_pad * 2            # conservative: 2 buffers
    lhat_stream_bytes = 2 * tile_n * tile_n * 2
    misc_bytes = 2 * 1024 * 1024                      # weights, biases, output, slack

    lhat_resident = (txs_bytes + acc_bytes + xT_bytes + lhat_res_bytes + misc_bytes
                     <= 40 * 1024 * 1024)
    lhat_bytes = lhat_res_bytes if lhat_resident else lhat_stream_bytes
    vmem_limit = txs_bytes + acc_bytes + xT_bytes + lhat_bytes + misc_bytes + (2 << 20)
    vmem_limit = int(min(64 * 1024 * 1024, max(16 * 1024 * 1024, vmem_limit)))

    if lhat_resident:
        lhat_spec = pl.BlockSpec((n_pad, n_pad), lambda s, i, j: (0, 0))   # fetched once
    else:
        lhat_spec = pl.BlockSpec((tile_n, tile_n), lambda s, i, j: (j, i))  # streamed tiles

    kernel = functools.partial(_critic_kernel, f_pad=f_pad, tile_n=tile_n,
                               lhat_resident=lhat_resident)

    grid = (K - 1, n_tiles, n_tiles)
    out = pl.pallas_call(
        kernel,
        out_shape=jax.ShapeDtypeStruct((1, n_pad), jnp.float32),
        grid_spec=pltpu.PrefetchScalarGridSpec(
            num_scalar_prefetch=0,
            grid=grid,
            in_specs=[
                pl.BlockSpec((f_pad, n_pad), lambda s, i, j: (0, 0)),       # x^T, resident
                lhat_spec,                                                  # L_hat^T
                pl.BlockSpec((h_pad, K * f_pad), lambda s, i, j: (0, 0)),   # fused W^T
                pl.BlockSpec((h_pad, 1), lambda s, i, j: (0, 0)),           # Cheb bias col
                pl.BlockSpec((h_pad, 1), lambda s, i, j: (0, 0)),           # final weight col
                pl.BlockSpec(memory_space=pltpu.MemorySpace.SMEM),          # final bias scalar
            ],
            out_specs=pl.BlockSpec((1, tile_n), lambda s, i, j: (0, i)),
            scratch_shapes=[
                pltpu.VMEM((K * f_pad, n_pad), jnp.float32),  # transposed basis Tx_0..Tx_{K-1}
                pltpu.VMEM((f_pad, tile_n), jnp.float32),     # per-node-tile f32 accumulator
            ],
        ),
        compiler_params=pltpu.CompilerParams(
            # Row-tile axis stays 'arbitrary': the shared Tx scratch couples tiles across
            # sweeps (see TODO(synk) above for the v7x dual-core variant).
            dimension_semantics=("arbitrary", "arbitrary", "arbitrary"),
            vmem_limit_bytes=vmem_limit,
        ),
    )(xT, lhatT_bf16, wT, b_col, wf_col, bf_scalar)

    return out[0, :N]


def reference_forward(features, adj, w_cheb, b_cheb, w_final, b_final):
    """Pure-JAX reference mirroring the kernel's mixed precision: L_hat and the Tx operand
    of each L_hat @ Tx matmul are rounded to bf16; all accumulation stays float32."""
    hi = jax.lax.Precision.HIGHEST
    q = lambda t: t.astype(jnp.bfloat16).astype(jnp.float32)
    x = features.astype(jnp.float32)
    lhat = q(scaled_cheb_laplacian(adj.astype(jnp.float32)))
    K = w_cheb.shape[0]
    tx = [x]
    if K > 1:
        tx.append(jnp.dot(lhat, q(x), precision=hi))
    for _ in range(2, K):
        tx.append(2.0 * jnp.dot(lhat, q(tx[-1]), precision=hi) - tx[-2])
    out = sum(jnp.dot(tx[k], w_cheb[k], precision=hi) for k in range(K))
    h = jnp.tanh(out + b_cheb.reshape(1, -1))
    y = jnp.dot(h, w_final.reshape(-1, 1), precision=hi) + b_final.reshape(1, 1)
    return y.reshape(-1)


if __name__ == "__main__":
    # Small synthetic problem: N nodes, F input features, H hiddens, K Chebyshev filters.
    # tile_n=256 with N=512 exercises a multi-tile (2 x 2) grid plus the recurrence axis.
    N, F, H, K = 512, 8, 32, 3

    key = jax.random.PRNGKey(0)
    k_x, k_adj, k_w, k_b, k_wf, k_bf = jax.random.split(key, 6)

    # Node features.
    x = jax.random.normal(k_x, (N, F), dtype=jnp.float32)

    # Random symmetric binary adjacency with zero diagonal (stands in for edge_index).
    a = (jax.random.uniform(k_adj, (N, N)) < 0.1).astype(jnp.float32)
    adj = jnp.triu(a, k=1)
    adj = adj + adj.T

    # Parameters with shapes matching ChebConv(F, H, K) + Linear(H, 1).
    w_cheb = jax.random.normal(k_w, (K, F, H), dtype=jnp.float32) * (1.0 / jnp.sqrt(F))
    b_cheb = jax.random.normal(k_b, (1, H), dtype=jnp.float32) * 0.01
    w_final = jax.random.normal(k_wf, (H, 1), dtype=jnp.float32) * (1.0 / jnp.sqrt(H))
    b_final = jax.random.normal(k_bf, (1, 1), dtype=jnp.float32) * 0.01

    y = critic_forward(x, adj, w_cheb, b_cheb, w_final, b_final, tile_n=256)
    jax.block_until_ready(y)

    y_ref = reference_forward(x, adj, w_cheb, b_cheb, w_final, b_final)
    assert y.shape == (N,)
    assert jnp.allclose(y, y_ref, atol=1e-3, rtol=1e-3), \
        float(jnp.max(jnp.abs(y - y_ref)))

    print("KERNEL_OK")
</pallas_src>

<mosaic_0001>
module attributes {stable_mosaic.version = 11 : i64} {
  func.func @_critic_kernel(%arg0: i32, %arg1: i32, %arg2: i32, %arg3: memref<8x512xf32, #tpu.memory_space<vmem>>, %arg4: memref<512x512xbf16, #tpu.memory_space<vmem>>, %arg5: memref<32x24xf32, #tpu.memory_space<vmem>>, %arg6: memref<32x1xf32, #tpu.memory_space<vmem>>, %arg7: memref<32x1xf32, #tpu.memory_space<vmem>>, %arg8: memref<1x1xf32, #tpu.memory_space<smem>>, %arg9: memref<1x256xf32, #tpu.memory_space<vmem>>, %arg10: memref<24x512xf32, #tpu.memory_space<vmem>>, %arg11: memref<8x256xf32, #tpu.memory_space<vmem>>) attributes {dimension_semantics = [#tpu.dimension_semantics<arbitrary>, #tpu.dimension_semantics<arbitrary>, #tpu.dimension_semantics<arbitrary>], iteration_bounds = array<i64: 2, 2, 2>, scalar_prefetch = 0 : i64, scratch_operands = 2 : i64, tpu.core_type = #tpu.core_type<tc>, window_params = [{pipeline_mode = #tpu.pipeline_mode<synchronous>, transform_indices = @transform_0, window_bounds = array<i64: 8, 512>}, {pipeline_mode = #tpu.pipeline_mode<synchronous>, transform_indices = @transform_1, window_bounds = array<i64: 512, 512>}, {pipeline_mode = #tpu.pipeline_mode<synchronous>, transform_indices = @transform_2, window_bounds = array<i64: 32, 24>}, {pipeline_mode = #tpu.pipeline_mode<synchronous>, transform_indices = @transform_3, window_bounds = array<i64: 32, 1>}, {pipeline_mode = #tpu.pipeline_mode<synchronous>, transform_indices = @transform_4, window_bounds = array<i64: 32, 1>}, {transform_indices = @transform_5, window_bounds = array<i64: 1, 1>}, {transform_indices = @transform_6, window_bounds = array<i64: 1, 256>}]} {
    %c256_i32 = arith.constant 256 : i32
    %0 = arith.muli %arg2, %c256_i32 : i32
    %1 = tpu.assume_multiple %0, 256 : i32
    %c256_i32_0 = arith.constant 256 : i32
    %2 = arith.muli %arg1, %c256_i32_0 : i32
    %3 = tpu.assume_multiple %2, 256 : i32
    %c0_i32 = arith.constant 0 : i32
    %4 = arith.cmpi eq, %arg0, %c0_i32 : i32
    %c0_i32_1 = arith.constant 0 : i32
    %5 = arith.cmpi eq, %arg1, %c0_i32_1 : i32
    %6 = arith.andi %4, %5 : i1
    %7 = arith.extui %6 : i1 to i32
    %c0_i32_2 = arith.constant 0 : i32
    %8 = arith.cmpi ne, %7, %c0_i32_2 : i32
    scf.if %8 {
      %c0_9 = arith.constant 0 : index
      %28 = arith.index_cast %1 : i32 to index
      %29 = vector.load %arg3[%c0_9, %28] : memref<8x512xf32, #tpu.memory_space<vmem>>, vector<8x256xf32>
      %c0_10 = arith.constant 0 : index
      %30 = arith.index_cast %1 : i32 to index
      %31 = vector.load %arg10[%c0_10, %30] : memref<24x512xf32, #tpu.memory_space<vmem>>, vector<8x256xf32>
      tpu.vector_store %arg10[%c0_10, %30], %29 {strides = array<i32>} : memref<24x512xf32, #tpu.memory_space<vmem>>, vector<8x256xf32>,
    } else {
    }
    %c0_i32_3 = arith.constant 0 : i32
    %9 = arith.cmpi eq, %arg2, %c0_i32_3 : i32
    %10 = arith.extui %9 : i1 to i32
    %c0_i32_4 = arith.constant 0 : i32
    %11 = arith.cmpi ne, %10, %c0_i32_4 : i32
    scf.if %11 {
      %cst_9 = arith.constant 0.000000e+00 : f32
      %28 = vector.broadcast %cst_9 : f32 to vector<8x256xf32>
      %c0_10 = arith.constant 0 : index
      %c0_11 = arith.constant 0 : index
      %29 = vector.load %arg11[%c0_10, %c0_11] : memref<8x256xf32, #tpu.memory_space<vmem>>, vector<8x256xf32>
      tpu.vector_store %arg11[%c0_10, %c0_11], %28 {strides = array<i32>} : memref<8x256xf32, #tpu.memory_space<vmem>>, vector<8x256xf32>,
      %cst_12 = arith.constant 0.000000e+00 : f32
      %30 = vector.broadcast %cst_12 : f32 to vector<1x256xf32>
      %c0_13 = arith.constant 0 : index
      %c0_14 = arith.constant 0 : index
      %31 = vector.load %arg9[%c0_13, %c0_14] : memref<1x256xf32, #tpu.memory_space<vmem>>, vector<1x256xf32>
      tpu.vector_store %arg9[%c0_13, %c0_14], %30 {strides = array<i32>} : memref<1x256xf32, #tpu.memory_space<vmem>>, vector<1x256xf32>,
    } else {
    }
    %c8_i32 = arith.constant 8 : i32
    %12 = arith.muli %arg0, %c8_i32 : i32
    %13 = tpu.assume_multiple %12, 8 : i32
    %14 = arith.index_cast %13 : i32 to index
    %15 = arith.index_cast %1 : i32 to index
    %16 = vector.load %arg10[%14, %15] : memref<24x512xf32, #tpu.memory_space<vmem>>, vector<8x256xf32>
    %17 = arith.truncf %16 : vector<8x256xf32> to vector<8x256xbf16>
    %18 = arith.index_cast %1 : i32 to index
    %19 = arith.index_cast %3 : i32 to index
    %20 = vector.load %arg4[%18, %19] : memref<512x512xbf16, #tpu.memory_space<vmem>>, vector<256x256xbf16>
    %c0 = arith.constant 0 : index
    %c0_5 = arith.constant 0 : index
    %21 = vector.load %arg11[%c0, %c0_5] : memref<8x256xf32, #tpu.memory_space<vmem>>, vector<8x256xf32>
    %cst = arith.constant dense<0.000000e+00> : vector<8x256xf32>
    %22 = tpu.matmul %17, %20, %cst {dimension_numbers = #tpu.dot_dimension_numbers<[1], [0], [0], [1], [0, 0, 1, 1], [], []>} : vector<8x256xbf16>, vector<256x256xbf16>, vector<8x256xf32> -> vector<8x256xf32>
    %23 = arith.addf %21, %22 : vector<8x256xf32>
    %c0_6 = arith.constant 0 : index
    %c0_7 = arith.constant 0 : index
    %24 = vector.load %arg11[%c0_6, %c0_7] : memref<8x256xf32, #tpu.memory_space<vmem>>, vector<8x256xf32>
    tpu.vector_store %arg11[%c0_6, %c0_7], %23 {strides = array<i32>} : memref<8x256xf32, #tpu.memory_space<vmem>>, vector<8x256xf32>,
    %c1_i32 = arith.constant 1 : i32
    %25 = arith.cmpi eq, %arg2, %c1_i32 : i32
    %26 = arith.extui %25 : i1 to i32
    %c0_i32_8 = arith.constant 0 : i32
    %27 = arith.cmpi ne, %26, %c0_i32_8 : i32
    scf.if %27 {
      %c0_i32_9 = arith.constant 0 : i32
      %28 = arith.cmpi eq, %arg0, %c0_i32_9 : i32
      %cst_10 = arith.constant 1.000000e+00 : f32
      %cst_11 = arith.constant 2.000000e+00 : f32
      %29 = arith.select %28, %cst_10, %cst_11 : f32
      %c0_i32_12 = arith.constant 0 : i32
      %30 = arith.cmpi eq, %arg0, %c0_i32_12 : i32
      %cst_13 = arith.constant 0.000000e+00 : f32
      %cst_14 = arith.constant 1.000000e+00 : f32
      %31 = arith.select %30, %cst_13, %cst_14 : f32
      %c1_i32_15 = arith.constant 1 : i32
      %32 = arith.subi %arg0, %c1_i32_15 : i32
      %c0_i32_16 = arith.constant 0 : i32
      %33 = arith.maxsi %32, %c0_i32_16 : i32
      %c8_i32_17 = arith.constant 8 : i32
      %34 = arith.muli %33, %c8_i32_17 : i32
      %35 = tpu.assume_multiple %34, 8 : i32
      %c0_18 = arith.constant 0 : index
      %c0_19 = arith.constant 0 : index
      %36 = vector.load %arg11[%c0_18, %c0_19] : memref<8x256xf32, #tpu.memory_space<vmem>>, vector<8x256xf32>
      %37 = vector.broadcast %29 : f32 to vector<8x256xf32>
      %38 = arith.mulf %37, %36 : vector<8x256xf32>
      %39 = arith.index_cast %35 : i32 to index
      %40 = arith.index_cast %3 : i32 to index
      %41 = vector.load %arg10[%39, %40] : memref<24x512xf32, #tpu.memory_space<vmem>>, vector<8x256xf32>
      %42 = vector.broadcast %31 : f32 to vector<8x256xf32>
      %43 = arith.mulf %42, %41 : vector<8x256xf32>
      %44 = arith.subf %38, %43 : vector<8x256xf32>
      %c1_i32_20 = arith.constant 1 : i32
      %45 = arith.addi %arg0, %c1_i32_20 : i32
      %c8_i32_21 = arith.constant 8 : i32
      %46 = arith.muli %45, %c8_i32_21 : i32
      %47 = tpu.assume_multiple %46, 8 : i32
      %48 = arith.index_cast %47 : i32 to index
      %49 = arith.index_cast %3 : i32 to index
      %50 = vector.load %arg10[%48, %49] : memref<24x512xf32, #tpu.memory_space<vmem>>, vector<8x256xf32>
      tpu.vector_store %arg10[%48, %49], %44 {strides = array<i32>} : memref<24x512xf32, #tpu.memory_space<vmem>>, vector<8x256xf32>,
      %c1_i32_22 = arith.constant 1 : i32
      %51 = arith.cmpi eq, %arg0, %c1_i32_22 : i32
      %52 = arith.extui %51 : i1 to i32
      %c0_i32_23 = arith.constant 0 : i32
      %53 = arith.cmpi ne, %52, %c0_i32_23 : i32
      scf.if %53 {
        %c0_24 = arith.constant 0 : index
        %54 = arith.index_cast %3 : i32 to index
        %55 = vector.load %arg10[%c0_24, %54] : memref<24x512xf32, #tpu.memory_space<vmem>>, vector<24x256xf32>
        %c0_25 = arith.constant 0 : index
        %c0_26 = arith.constant 0 : index
        %56 = vector.load %arg5[%c0_25, %c0_26] : memref<32x24xf32, #tpu.memory_space<vmem>>, vector<32x24xf32>
        %cst_27 = arith.constant dense<0.000000e+00> : vector<32x256xf32>
        %57 = tpu.matmul %56, %55, %cst_27 {dimension_numbers = #tpu.dot_dimension_numbers<[1], [0], [0], [1], [0, 0, 1, 1], [], []>} : vector<32x24xf32>, vector<24x256xf32>, vector<32x256xf32> -> vector<32x256xf32>
        %c0_28 = arith.constant 0 : index
        %c0_29 = arith.constant 0 : index
        %58 = vector.load %arg6[%c0_28, %c0_29] : memref<32x1xf32, #tpu.memory_space<vmem>>, vector<32x1xf32>
        %59 = vector.broadcast %58 : vector<32x1xf32> to vector<32x256xf32>
        %60 = arith.addf %57, %59 : vector<32x256xf32>
        %61 = math.tanh %60 : vector<32x256xf32>
        %c0_30 = arith.constant 0 : index
        %c0_31 = arith.constant 0 : index
        %62 = vector.load %arg7[%c0_30, %c0_31] : memref<32x1xf32, #tpu.memory_space<vmem>>, vector<32x1xf32>
        %63 = vector.broadcast %62 : vector<32x1xf32> to vector<32x256xf32>
        %64 = arith.mulf %61, %63 : vector<32x256xf32>
        %cst_32 = arith.constant dense<0.000000e+00> : vector<256xf32>
        %65 = vector.multi_reduction <add>, %64, %cst_32 [0] : vector<32x256xf32> to vector<256xf32>
        %66 = vector.shape_cast %65 : vector<256xf32> to vector<1x256xf32>
        %c0_33 = arith.constant 0 : index
        %c0_34 = arith.constant 0 : index
        %67 = memref.load %arg8[%c0_33, %c0_34] : memref<1x1xf32, #tpu.memory_space<smem>>
        %68 = vector.broadcast %67 : f32 to vector<1x256xf32>
        %69 = arith.addf %66, %68 : vector<1x256xf32>
        %c0_35 = arith.constant 0 : index
        %c0_36 = arith.constant 0 : index
        %70 = vector.load %arg9[%c0_35, %c0_36] : memref<1x256xf32, #tpu.memory_space<vmem>>, vector<1x256xf32>
        tpu.vector_store %arg9[%c0_35, %c0_36], %69 {strides = array<i32>} : memref<1x256xf32, #tpu.memory_space<vmem>>, vector<1x256xf32>,
      } else {
      }
    } else {
    }
    return
  }
  func.func @transform_0(%arg0: i32, %arg1: i32, %arg2: i32) -> (i32, i32) {
    %c0_i32 = arith.constant 0 : i32
    %c0_i32_0 = arith.constant 0 : i32
    %c0_i32_1 = arith.constant 0 : i32
    return %c0_i32, %c0_i32_0 : i32, i32
  }
  func.func @transform_1(%arg0: i32, %arg1: i32, %arg2: i32) -> (i32, i32) {
    %c0_i32 = arith.constant 0 : i32
    %c0_i32_0 = arith.constant 0 : i32
    %c0_i32_1 = arith.constant 0 : i32
    return %c0_i32, %c0_i32_0 : i32, i32
  }
  func.func @transform_2(%arg0: i32, %arg1: i32, %arg2: i32) -> (i32, i32) {
    %c0_i32 = arith.constant 0 : i32
    %c0_i32_0 = arith.constant 0 : i32
    %c0_i32_1 = arith.constant 0 : i32
    return %c0_i32, %c0_i32_0 : i32, i32
  }
  func.func @transform_3(%arg0: i32, %arg1: i32, %arg2: i32) -> (i32, i32) {
    %c0_i32 = arith.constant 0 : i32
    %c0_i32_0 = arith.constant 0 : i32
    %c0_i32_1 = arith.constant 0 : i32
    return %c0_i32, %c0_i32_0 : i32, i32
  }
  func.func @transform_4(%arg0: i32, %arg1: i32, %arg2: i32) -> (i32, i32) {
    %c0_i32 = arith.constant 0 : i32
    %c0_i32_0 = arith.constant 0 : i32
    %c0_i32_1 = arith.constant 0 : i32
    return %c0_i32, %c0_i32_0 : i32, i32
  }
  func.func @transform_5(%arg0: i32, %arg1: i32, %arg2: i32) -> (i32, i32) {
    %c0_i32 = arith.constant 0 : i32
    %c0_i32_0 = arith.constant 0 : i32
    %c0_i32_1 = arith.constant 0 : i32
    return %c0_i32, %c0_i32_0 : i32, i32
  }
  func.func @transform_6(%arg0: i32, %arg1: i32, %arg2: i32) -> (i32, i32) {
    %c0_i32 = arith.constant 0 : i32
    %c0_i32_0 = arith.constant 0 : i32
    return %c0_i32, %arg1 : i32, i32
  }
}

</mosaic_0001>

<bundles_post_ra>
// kernel: critic_forward.1
= control target key start
LH: loop header
LB: loop body
LE: loop exit
PB: predicated region body
PF: predicated region fallthrough
CT: control target
= control target key end

     0   :  { %s1559_s0 = inlined_call_operand.vmem [shape: f32[8,512], index: 0, kind: input, shape index: {}]   ;;  %s1560_s1 = inlined_call_operand.vmem [shape: bf16[512,512], index: 1, kind: input, shape index: {}]   ;;  %s1561_s2 = inlined_call_operand.vmem [shape: f32[32,24], index: 2, kind: input, shape index: {}]   ;;  %s1562_s3 = inlined_call_operand.vmem [shape: f32[32,1], index: 3, kind: input, shape index: {}]   ;;  %s1563_s4 = inlined_call_operand.vmem [shape: f32[32,1], index: 4, kind: input, shape index: {}]   ;;  %s1564_s5 = inlined_call_operand.<no memory space> [shape: f32[1,1], index: 5, kind: input, shape index: {}]   ;;  %s1565_s6 = inlined_call_operand.hbm [shape: f32[1,512], index: 6, kind: output, shape index: {}]  }
   0x1   :  { %1569 = sst [smem:[#allocation12_spill]] %s1559_s0 }
   0x2   :  { %1570 = sst [smem:[#allocation13_spill]] %s1560_s1 }
   0x3   :  { %11 = sst [smem:[#allocation4]] %s1564_s5 }
   0x4   :  { %12 = vsyncpa [#allocation6], 0 }
   0x5   :  { %14 = vsyncpa [#allocation6 + $0x1], 0  ;;  %s1295_s23 = smov 0   ;;  %s1297_s24 = smov 0  }
   0x6   :  { %s1299_s25 = smov 0   ;;  %s1301_s26 = smov 0  }
   0x7   :  { %s1303_s27 = smov 0   ;;  %s1305_s28 = smov 0  }
   0x8   :  { %s1307_s29 = smov 0   ;;  %s1309_s30 = smov 0  }
   0x9   :  { %s1311_s7 = smov 0   ;;  %s1313_s5 = smov 0  }
   0xa LB: > { %1571 = sst [smem:[#allocation8_spill]] %s1246_s7  ;;  %s906_s8 = sadd.s32 4294967295, %s1250_s5   ;;  %s1250_s5 = sphi %s1313_s5, %s20_s5   ;;  %s1246_s7 = sphi %s1311_s7, %s1583_s7   ;;  %s1242_s30 = sphi %s1309_s30, %s1590_s30   ;;  %s1238_s29 = sphi %s1307_s29, %s1589_s29   ;;  %s1234_s28 = sphi %s1305_s28, %s1580_s28   ;;  %s1230_s27 = sphi %s1303_s27, %s1588_s27   ;;  %s1226_s26 = sphi %s1301_s26, %s1587_s26   ;;  %s1222_s25 = sphi %s1299_s25, %s1586_s25   ;;  %s1218_s24 = sphi %s1297_s24, %s1585_s24   ;;  %s1214_s23 = sphi %s1295_s23, %s1584_s23  }
   0xb   : > { %s907_s9 = sadd.s32 4294967294, %s1250_s5   ;;  %s32_s10 = sadd.s32 1, %s1238_s29 }
   0xc   : > { %s35_s11 = sadd.s32 1, %s1242_s30  ;;  %p33_p0 = scmp.ge.s32.totalorder %s32_s10, 2 }
   0xd   : > { %s39_s12 = sadd.s32 1, %s1246_s7  ;;  %s172_s13 = sadd.s32 1, %s1222_s25 }
   0xe   : > { %p182_p1 = scmp.ne.s32.totalorder %s1222_s25, %s1218_s24  ;;  %s1592_s10 = smov (%p33_p0, %s32_s10), 0 }
   0xf   : > { %1572 = sst [smem:[#allocation9_spill]] %s1592_s10  ;;  %s1594_s11 = smov (!%p33_p0, %s35_s11), %s1242_s30 }
  0x10   : > { %p183_p2 = scmp.eq.s32.totalorder %s906_s8, 7  ;;  %p188_p3 = scmp.ne.s32.totalorder %s1218_s24, %s1214_s23 }
  0x11   : > { %p37_p4 = scmp.ge.s32.totalorder %s1594_s11, 2  ;;  %p189_p5 = scmp.eq.s32.totalorder %s907_s9, 7 }
  0x12   : > { %p1358_p6 = por %p183_p2, %p182_p1  ;;  %p909_p7 = scmp.ge.s32.totalorder %s1250_s5, 1 }
  0x13   : > { %s1596_s11 = smov (%p37_p4, %s1594_s11), 0  ;;  %s1598_s12 = smov (!%p37_p4, %s39_s12), %s1246_s7 }
  0x14   : > { %1574 = sst [smem:[#allocation10_spill]] %s1596_s11  ;;  %s169_s15 = ssub.s32 %s1242_s30, %s1596_s11 }
  0x15   : > { %p1368_p8 = por %p189_p5, %p188_p3  ;;  %p41_p9 = scmp.ge.s32.totalorder %s1598_s12, 2 }
  0x16   : > { %p170_p10 = scmp.eq.s32.totalorder %s169_s15, 0  ;;  %p225_p11 = scmp.lt.s32.totalorder %s1250_s5, 9 }
  0x17   : > { %s1600_s12 = smov (%p41_p9, %s1598_s12), 0 }
  0x18   : > { %1576 = sst [smem:[#allocation11_spill]] %s1600_s12  ;;  %p226_p12 = pnand %p909_p7, %p225_p11 }
  0x19   : > { %s1376_s17 = scalar_select %p170_p10, %s1222_s25, %s172_s13  }
  0x1a   : > { %229 = sbr.rel (%p226_p12) target bundleno = 657 (0x291), region = 44  ;;  %s1567_s18 = sand.u32 (!%p226_p12), 1, %s1218_s24  }
  0x1b   : > { %s1380_s19 = sshll.u32 (!%p226_p12), %s1226_s26, 8  ;;  %s910_s20 = sshll.u32 (!%p226_p12), %s1567_s18, 1 }
  0x1c   : > { %s912_s21 = sshll.u32 (!%p226_p12), %s1230_s27, 8  ;;  %p253_p13 = scmp.eq.s32.totalorder (!%p226_p12), %s1234_s28, 0 }
  0x1d   : > { %p254_p0 = scmp.eq.s32.totalorder (!%p226_p12), %s1230_s27, 0  ;;  %s1389_s22 = scalar_lea.vmem (!%p226_p12), [#allocation5], %s910_s20 }
  0x1f   : > { %p255_p1 = pnand (!%p226_p12), %p254_p0, %p253_p13 }
  0x21   : > { %258 = sbr.rel (%p255_p1) target bundleno = 43 (0x2b), region = 48  ;;  %s259_s8 = sshra.s32 (!%p255_p1), %s1380_s19, 7 }
  0x22   : > { %s913_s9 = sshll.u32 (!%p255_p1), %s259_s8, 3  ;;  %s1577_s0 = sld [smem:[#allocation12_spill]] (!%p255_p1) }
  0x23   : > { %s266_s11 = scalar_lea.vmem (!%p255_p1), [#allocation2], %s913_s9 }
  0x28   : > { %s262_s12 = scalar_lea.vmem %s1577_s0, %s913_s9 }
  0x29   : > { %v263_v0 = vld [vmem:[%s262_s12] sm:$0xff]  ;;  %v264_v1 = vld [vmem:[%s262_s12 + $0x8] sm:$0xff] }
  0x2a   : > { %267 = vst [vmem:[%s266_s11] sm:$0xff] %v263_v0  ;;  %268 = vst [vmem:[%s266_s11 + $0x8] sm:$0xff] %v264_v1 }
  0x2b PF: > { %p915_p2 = scmp.ne.s32.totalorder %s1226_s26, 0 }
  0x2c   : > { %v275_v2 = vlaneseq (!%p915_p2)  ;;  %v1252_v3 = vmov (!%p915_p2), 0.0  }
  0x2d   : > { %272 = sbr.rel (%p915_p2) target bundleno = 52 (0x34), region = 52  ;;  %273 = vst [vmem:[#allocation3] sm:$0xff] (!%p915_p2), %v1252_v3  ;;  %274 = vst [vmem:[#allocation3 + $0x8] sm:$0xff] (!%p915_p2), %v1252_v3 }
  0x2e   : > { %vm277_vm0 = vcmp.lt.s32.totalorder (!%p915_p2), %v275_v2, 256 }
  0x2f   : > { %279 = vst.msk [vmem:[%s1389_s22] sm:$0x3] (!%p915_p2), %vm277_vm0, %v1252_v3 }
  0x34 PF: > { %s1397_s20 = sshra.s32 %s912_s21, 7  ;;  %s295_s12 = sshra.s32 %s1380_s19, 3  ;;  %v333_v40 = vld [vmem:[#allocation3] sm:$0xff]  ;;  %v334_v41 = vld [vmem:[#allocation3 + $0x8] sm:$0xff] }
  0x35   : > { %s919_s11 = sshll.u32 %s295_s12, 2  ;;  %s1578_s1 = sld [smem:[#allocation13_spill]] }
  0x36   : > { %s298_s8 = sadd.s32 %s919_s11, %s1397_s20  ;;  %s916_s21 = sshll.u32 %s1234_s28, 3 }
  0x37   : > { %s920_s9 = sshll.u32 %s298_s8, 2  ;;  %s283_s12 = sshra.s32 %s916_s21, 3 }
  0x38   : > { %s281_s11 = sshra.s32 %s1380_s19, 7  ;;  %s917_s8 = sshll.u32 %s283_s12, 2 }
  0x39   : > { %p953_p3 = scmp.ne.s32.totalorder %s1226_s26, 1 }
  0x3a   : > { %s954_s15 = sadd.s32 (!%p953_p3), 4294967295, %s1234_s28  ;;  %s973_s12 = sadd.s32 (!%p953_p3), 8, %s916_s21 }
  0x3b   : > { %s1404_s18 = scalar_lea.vmem %s1578_s1, %s920_s9  ;;  %s286_s9 = sadd.s32 %s917_s8, %s281_s11 }
  0x3c   : > { %v1074_v4 = vld [vmem:[%s1404_s18 + $0x4] ss:$16 sps:$4 sm:$0xff]   ;;  %v1076_v5 = vld [vmem:[%s1404_s18] ss:$16 sps:$4 sm:$0xff]   ;;  %s918_s13 = sshll.u32 %s286_s9, 3  ;;  %p547_p4 = scmp.gt.s32.totalorder (!%p953_p3), %s954_s15, 0 }
  0x3d   : > { %495 = vmatprep.subr.bf16.mxu0 %v1074_v4  ;;  %v1077_v6 = vld [vmem:[%s1404_s18 + $0x24] ss:$16 sps:$4 sm:$0xff]   ;;  %v1079_v7 = vld [vmem:[%s1404_s18 + $0x20] ss:$16 sps:$4 sm:$0xff]   ;;  %s1423_s19 = scalar_lea.vmem [#allocation2], %s918_s13  ;;  %s570_s11 = sshra.s32 (!%p953_p3), %s973_s12, 3 }
  0x3e   : > { %496 = vmatpush1.bf16.msra.mxu0 %v1076_v5  ;;  %v1080_v8 = vld [vmem:[%s1404_s18 + $0x44] ss:$16 sps:$4 sm:$0xff]   ;;  %v1082_v9 = vld [vmem:[%s1404_s18 + $0x40] ss:$16 sps:$4 sm:$0xff]   ;;  %v290_v17 = vld [vmem:[%s1423_s19 + $0x8] sm:$0xff]  ;;  %s959_s9 = sshll.u32 (!%p953_p3), %s570_s11, 2 }
  0x3f   : > { %497 = vmatprep.subr.bf16.mxu0 %v1077_v6  ;;  %v1083_v10 = vld [vmem:[%s1404_s18 + $0x64] ss:$16 sps:$4 sm:$0xff]   ;;  %v1085_v11 = vld [vmem:[%s1404_s18 + $0x60] ss:$16 sps:$4 sm:$0xff]   ;;  %v292_v18 = vpack.c.bf16 %v290_v17, %v290_v17  ;;  %s573_s0 = sadd.s32 (!%p953_p3), %s959_s9, %s1397_s20  ;;  %p961_p5 = scmp.ne.s32.totalorder (!%p953_p3), %s1234_s28, 1 }
  0x40   : > { %v1086_v12 = vld [vmem:[%s1404_s18 + $0x84] ss:$16 sps:$4 sm:$0xff]   ;;  %v1088_v13 = vld [vmem:[%s1404_s18 + $0x80] ss:$16 sps:$4 sm:$0xff]   ;;  %s960_s7 = sshll.u32 (!%p953_p3), %s573_s0, 3 }
  0x41   : > { %v1089_v14 = vld [vmem:[%s1404_s18 + $0xa4] ss:$16 sps:$4 sm:$0xff]   ;;  %v1091_v15 = vld [vmem:[%s1404_s18 + $0xa0] ss:$16 sps:$4 sm:$0xff]   ;;  %527 = vmatprep.mubr.bf16.mxu0 %v292_v18 }
  0x42   : > { %498 = vmatpush1.bf16.msra.mxu0 %v1079_v7  ;;  %v1092_v16 = vld [vmem:[%s1404_s18 + $0xc4] ss:$16 sps:$4 sm:$0xff]   ;;  %v1094_v19 = vld [vmem:[%s1404_s18 + $0xc0] ss:$16 sps:$4 sm:$0xff]  }
  0x43   : > { %499 = vmatprep.subr.bf16.mxu0 %v1080_v8  ;;  %v1095_v20 = vld [vmem:[%s1404_s18 + $0xe4] ss:$16 sps:$4 sm:$0xff]   ;;  %v1097_v21 = vld [vmem:[%s1404_s18 + $0xe0] ss:$16 sps:$4 sm:$0xff]  }
  0x44   : > { %v1098_v22 = vld [vmem:[%s1404_s18 + $0x104] ss:$16 sps:$4 sm:$0xff]   ;;  %v1100_v23 = vld [vmem:[%s1404_s18 + $0x100] ss:$16 sps:$4 sm:$0xff]  }
  0x45   : > { %v1101_v24 = vld [vmem:[%s1404_s18 + $0x124] ss:$16 sps:$4 sm:$0xff]   ;;  %v1103_v25 = vld [vmem:[%s1404_s18 + $0x120] ss:$16 sps:$4 sm:$0xff]  }
  0x46   : > { %500 = vmatpush1.bf16.msra.mxu0 %v1082_v9  ;;  %v1104_v26 = vld [vmem:[%s1404_s18 + $0x144] ss:$16 sps:$4 sm:$0xff]   ;;  %v1106_v27 = vld [vmem:[%s1404_s18 + $0x140] ss:$16 sps:$4 sm:$0xff]  }
  0x47   : > { %501 = vmatprep.subr.bf16.mxu0 %v1083_v10  ;;  %v1107_v28 = vld [vmem:[%s1404_s18 + $0x164] ss:$16 sps:$4 sm:$0xff]   ;;  %v1109_v29 = vld [vmem:[%s1404_s18 + $0x160] ss:$16 sps:$4 sm:$0xff]  }
  0x48   : > { %v1110_v30 = vld [vmem:[%s1404_s18 + $0x184] ss:$16 sps:$4 sm:$0xff]   ;;  %v1112_v31 = vld [vmem:[%s1404_s18 + $0x180] ss:$16 sps:$4 sm:$0xff]  }
  0x49   : > { %v1113_v32 = vld [vmem:[%s1404_s18 + $0x1a4] ss:$16 sps:$4 sm:$0xff]   ;;  %v1115_v33 = vld [vmem:[%s1404_s18 + $0x1a0] ss:$16 sps:$4 sm:$0xff]  }
  0x4a   : > { %502 = vmatpush1.bf16.msra.mxu0 %v1085_v11  ;;  %v1116_v34 = vld [vmem:[%s1404_s18 + $0x1c4] ss:$16 sps:$4 sm:$0xff]   ;;  %v1118_v35 = vld [vmem:[%s1404_s18 + $0x1c0] ss:$16 sps:$4 sm:$0xff]  }
  0x4b   : > { %503 = vmatprep.subr.bf16.mxu0 %v1086_v12  ;;  %v1119_v36 = vld [vmem:[%s1404_s18 + $0x1e4] ss:$16 sps:$4 sm:$0xff]   ;;  %v1121_v37 = vld [vmem:[%s1404_s18 + $0x1e0] ss:$16 sps:$4 sm:$0xff]  }
  0x4c   : > { %v289_v38 = vld [vmem:[%s1423_s19] sm:$0xff] }
  0x4d   : > { %v291_v39 = vpack.c.bf16 %v289_v38, %v289_v38 }
  0x4e   : > { %504 = vmatpush1.bf16.msra.mxu0 %v1088_v13 }
  0x4f   : > { %505 = vmatprep.subr.bf16.mxu0 %v1089_v14 }
  0x52   : > { %506 = vmatpush1.bf16.msra.mxu0 %v1091_v15 }
  0x53   : > { %507 = vmatprep.subr.bf16.mxu0 %v1092_v16 }
  0x56   : > { %508 = vmatpush1.bf16.msra.mxu0 %v1094_v19 }
  0x57   : > { %509 = vmatprep.subr.bf16.mxu0 %v1095_v20 }
  0x5a   : > { %510 = vmatpush1.bf16.msra.mxu0 %v1097_v21 }
  0x5b   : > { %511 = vmatprep.subr.bf16.mxu0 %v1098_v22 }
  0x5e   : > { %512 = vmatpush1.bf16.msra.mxu0 %v1100_v23 }
  0x5f   : > { %513 = vmatprep.subr.bf16.mxu0 %v1101_v24 }
  0x62   : > { %514 = vmatpush1.bf16.msra.mxu0 %v1103_v25 }
  0x63   : > { %515 = vmatprep.subr.bf16.mxu0 %v1104_v26 }
  0x66   : > { %516 = vmatpush1.bf16.msra.mxu0 %v1106_v27 }
  0x67   : > { %517 = vmatprep.subr.bf16.mxu0 %v1107_v28 }
  0x6a   : > { %518 = vmatpush1.bf16.msra.mxu0 %v1109_v29 }
  0x6b   : > { %519 = vmatprep.subr.bf16.mxu0 %v1110_v30 }
  0x6e   : > { %520 = vmatpush1.bf16.msra.mxu0 %v1112_v31 }
  0x6f   : > { %521 = vmatprep.subr.bf16.mxu0 %v1113_v32 }
  0x72   : > { %522 = vmatpush1.bf16.msra.mxu0 %v1115_v33 }
  0x73   : > { %523 = vmatprep.subr.bf16.mxu0 %v1116_v34 }
  0x76   : > { %524 = vmatpush1.bf16.msra.mxu0 %v1118_v35 }
  0x77   : > { %525 = vmatprep.subr.bf16.mxu0 %v1119_v36 }
  0x7a   : > { %526 = vmatpush1.bf16.msra.mxu0 %v1121_v37 }
  0x7d   : > { %528 = vmatmul.mubr.bf16.vlgmr.msra.gmra.mrb[0].mxu0 %v291_v39 }
 0x14e   : > { %543 = sbr.rel (%p953_p3) target bundleno = 632 (0x278), region = 56 }
 0x150   : > { %v529_v42 = vpop.f32.mrb[0].mxu0 }
 0x151   : > { %v536_v43 = vadd.f32 %v529_v42, %v333_v40  ;;  %v531_v44 = vpop.f32.mrb[1].mxu0 }
 0x152   : > { %v537_v45 = vadd.f32 %v531_v44, %v334_v41  ;;  %v533_v46 = vpop.f32.mrb[2].mxu0 }
 0x153   : > { %538 = vst [vmem:[#allocation3] sm:$0xff] %v536_v43  ;;  %v534_v47 = vpop.f32.mrb[3].mxu0 }
 0x154   : > { %539 = vst [vmem:[#allocation3 + $0x8] sm:$0xff] %v537_v45 }
 0x155   : > { %s544_s18 = scalar_select %p253_p13, 1.0, 2.0 }
 0x156   : > { %s545_s8 = scalar_select %p253_p13, 0.0, 1.0 }
 0x157   : > { %s1602_s15 = smov (!%p547_p4, %s954_s15), 0  ;;  %v552_v49 = vstv %s544_s18  ;;  %s962_s18 = sshll.u32 (!%p961_p5), %s1397_s20, 3  ;;  %v1253_v60 = vmov (!%p961_p5), 0.0   ;;  %v594_v61 = vld [vmem:[%s1562_s3] sm:$0xff] (!%p961_p5)  ;;  %v596_v62 = vld [vmem:[%s1562_s3 + $0x10] sm:$0xff] (!%p961_p5)  ;;  %v1254_v2 = vmov (!%p961_p5), 0  }
 0x158   : > { %s955_s13 = sshll.u32 %s1602_s15, 3  ;;  %v563_v51 = vstv %s545_s8  ;;  %s575_s15 = scalar_lea.vmem [#allocation2], %s960_s7  ;;  %695 = vmatprep.mubr.f32.mxu0 (!%p961_p5), %v1253_v60  ;;  %707 = vmatprep.mubr.f32.mxu1 (!%p961_p5), %v1253_v60  ;;  %v595_v7 = vld [vmem:[%s1562_s3 + $0x8] sm:$0xff] (!%p961_p5)  ;;  %v597_v8 = vld [vmem:[%s1562_s3 + $0x18] sm:$0xff] (!%p961_p5)  ;;  %v590_v10 = vld [vmem:[%s1561_s2] sm:$0xff] (!%p961_p5)  ;;  %vm618_vm1 = vcmask (!%p961_p5), 195584  }
 0x159   : > { %s555_s26 = sshra.s32 %s955_s13, 3  ;;  %s583_s11 = scalar_lea.vmem (!%p961_p5), [#allocation2], %s962_s18  ;;  %1122 = vset.pattern.permute.xlu0 (!%p961_p5), %v1254_v2  ;;  %1123 = vset.pattern.permute.xlu1 (!%p961_p5), %v1254_v2  ;;  %v592_v11 = vld [vmem:[%s1561_s2 + $0x10] sm:$0xff] (!%p961_p5)  ;;  %v728_v12 = vld [vmem:[%s1563_s4] sm:$0xff] (!%p961_p5)  ;;  %v729_v13 = vld [vmem:[%s1563_s4 + $0x8] sm:$0xff] (!%p961_p5) }
 0x15a   : > { %v550_v48 = vld [vmem:[#allocation3] sm:$0xff]  ;;  %s956_s19 = sshll.u32 %s555_s26, 2  ;;  %600 = vperm.xlu0 (!%p961_p5), %1122, %v594_v61   ;;  %610 = vperm.xlu1 (!%p961_p5), %1123, %v596_v62   ;;  %v591_v14 = vld [vmem:[%s1561_s2 + $0x8] sm:$0xff] (!%p961_p5)  ;;  %v593_v15 = vld [vmem:[%s1561_s2 + $0x18] sm:$0xff] (!%p961_p5)  ;;  %s778_s9 = sld [smem:[#allocation4]] (!%p961_p5) }
 0x15b   : > { %v551_v50 = vld [vmem:[#allocation3 + $0x8] sm:$0xff]  ;;  %s558_s1 = sadd.s32 %s956_s19, %s1397_s20  ;;  %v553_v52 = vmul.f32 %v552_v49, %v550_v48  ;;  %v730_v16 = vld [vmem:[%s1563_s4 + $0x10] sm:$0xff] (!%p961_p5)  ;;  %v731_v17 = vld [vmem:[%s1563_s4 + $0x18] sm:$0xff] (!%p961_p5) }
 0x15c   : > { %s957_s10 = sshll.u32 %s558_s1, 3  ;;  %v554_v53 = vmul.f32 %v552_v49, %v551_v50 }
 0x15d   : > { %s560_s21 = scalar_lea.vmem [#allocation2], %s957_s10  ;;  %581 = sbr.rel (%p961_p5) target bundleno = 632 (0x278), region = 60 }
 0x15e   : > { %v561_v54 = vld [vmem:[%s560_s21] sm:$0xff]  ;;  %v562_v55 = vld [vmem:[%s560_s21 + $0x8] sm:$0xff]  ;;  %605 = vperm.xlu0 (!%p961_p5), %1122, %v595_v7   ;;  %615 = vperm.xlu1 (!%p961_p5), %1123, %v597_v8   ;;  %v1255_v7 = vmov (!%p961_p5), 1966171168  }
 0x15f   : > { %v564_v56 = vmul.f32 %v563_v51, %v561_v54  ;;  %v565_v57 = vmul.f32 %v563_v51, %v562_v55  ;;  %v786_v8 = vunpack.c.l.s4 (!%p961_p5), %v1255_v7 }
 0x161   : > { %v566_v58 = vsub.f32 %v553_v52, %v564_v56  ;;  %v567_v59 = vsub.f32 %v554_v53, %v565_v57 }
 0x162   : > { %734 = vperm.xlu0 (!%p961_p5), %1122, %v728_v12   ;;  %739 = vperm.xlu1 (!%p961_p5), %1123, %v729_v13   ;;  %v779_v12 = vstv (!%p961_p5), %s778_s9 }
 0x163   : > { %576 = vst [vmem:[%s575_s15] sm:$0xff] %v566_v58  ;;  %577 = vst [vmem:[%s575_s15 + $0x8] sm:$0xff] %v567_v59 }
 0x166   : > { %744 = vperm.xlu0 %1122, %v730_v16   ;;  %749 = vperm.xlu1 %1123, %v731_v17  }
 0x16a   : > { %v585_v63 = vld [vmem:[%s583_s11 + $0x8] sm:$0xff]  ;;  %v584_v1 = vld [vmem:[%s583_s11] sm:$0xff] }
 0x16b   : > { %v587_v0 = vld [vmem:[%s583_s11 + $0x28] sm:$0xff]  ;;  %v586_v4 = vld [vmem:[%s583_s11 + $0x20] sm:$0xff] }
 0x16c   : > { %v975_v3 = vpack.c.bf16 %v587_v0, %v585_v63  ;;  %v977_v5 = vpack.c.bf16 %v586_v4, %v584_v1  ;;  %v589_v6 = vld [vmem:[%s583_s11 + $0x48] sm:$0xff]  ;;  %v588_v9 = vld [vmem:[%s583_s11 + $0x40] sm:$0xff] }
 0x16e   : > { %976 = vmatprep.subr.bf16.mxu0 %v975_v3  ;;  %979 = vmatprep.subr.bf16.mxu1 %v975_v3 }
 0x16f   : > { %978 = vmatpush1.bf16.msra.mxu0 %v977_v5  ;;  %981 = vmatpush1.bf16.msra.mxu1 %v977_v5 }
 0x170   : > { %635 = vmatprep.subr.mxu0 %v589_v6  ;;  %980 = vmatprep.subr.mxu1 %v589_v6 }
 0x173   : > { %636 = vmatpush1.msra.mxu0 %v588_v9  ;;  %982 = vmatpush1.msra.mxu1 %v588_v9  ;;  %v788_v9 = vlaneseq }
 0x174   : > { %963 = vmatmul.mubr.msk.f32.vlgmr.msra.gmra.mrb[0].mxu0 %vm618_vm1, %v590_v10  ;;  %965 = vmatmul.mubr.msk.f32.vlgmr.msra.gmra.mrb[0].mxu1 %vm618_vm1, %v592_v11 }
 0x175   : > { %701 = vmatprep.mubr.f32.mxu0 %v1253_v60  ;;  %713 = vmatprep.mubr.f32.mxu1 %v1253_v60  ;;  %v789_v16 = vshrl.u32 %v788_v9, 7  ;;  %vm802_vm2 = vcmp.lt.s32.totalorder %v788_v9, 256 }
 0x178   : > { %964 = vmatmul.mubr.msk.f32.gmra.mrb[2].mxu0 %vm618_vm1, %v591_v14  ;;  %966 = vmatmul.mubr.msk.f32.gmra.mrb[2].mxu1 %vm618_vm1, %v593_v15  ;;  %v787_v15 = vunpack.c.0.s8 %v786_v8 }
 0x1d9   : > { %v601_v18 = vpop.permute.xlu0 %600  ;;  %v611_v19 = vpop.permute.xlu1 %610 }
 0x1dd   : > { %v606_v28 = vpop.permute.xlu0 %605  ;;  %v616_v29 = vpop.permute.xlu1 %615 }
 0x1e1   : > { %v735_v39 = vpop.permute.xlu0 %734  ;;  %v740_v42 = vpop.permute.xlu1 %739 }
 0x1e5   : > { %v745_v49 = vpop.permute.xlu0 %744  ;;  %v750_v55 = vpop.permute.xlu1 %749 }
 0x247   : > { %v697_v20 = vpop.f32.mrb[0].mxu0  ;;  %v709_v21 = vpop.f32.mrb[0].mxu1 }
 0x248   : > { %v698_v22 = vadd.f32 %v697_v20, %v601_v18  ;;  %v710_v23 = vadd.f32 %v709_v21, %v611_v19  ;;  %v699_v24 = vpop.f32.mrb[1].mxu0  ;;  %v711_v25 = vpop.f32.mrb[1].mxu1  ;;  %v790_v20 = vsub.s32 %v787_v15, %v789_v16 }
 0x249   : > { %v700_v26 = vadd.f32 %v699_v24, %v601_v18  ;;  %v712_v27 = vadd.f32 %v711_v25, %v611_v19 }
 0x24a   : > { %1124 = vtanh.f32 %v698_v22 }
 0x24b   : > { %1126 = vtanh.f32 %v710_v23  ;;  %v703_v30 = vpop.f32.mrb[2].mxu0  ;;  %v715_v31 = vpop.f32.mrb[2].mxu1 }
 0x24c   : > { %1128 = vtanh.f32 %v700_v26  ;;  %v704_v32 = vadd.f32 %v703_v30, %v606_v28  ;;  %v716_v33 = vadd.f32 %v715_v31, %v616_v29  ;;  %v705_v34 = vpop.f32.mrb[3].mxu0  ;;  %v717_v35 = vpop.f32.mrb[3].mxu1 }
 0x24d   : > { %1130 = vtanh.f32 %v712_v27  ;;  %v706_v36 = vadd.f32 %v705_v34, %v606_v28  ;;  %v718_v37 = vadd.f32 %v717_v35, %v616_v29 }
 0x24e   : > { %1132 = vtanh.f32 %v704_v32 }
 0x24f   : > { %1134 = vtanh.f32 %v716_v33 }
 0x250   : > { %1136 = vtanh.f32 %v706_v36 }
 0x251   : > { %1138 = vtanh.f32 %v718_v37 }
 0x254   : > { %v1125_v38 = vpop.eup %1124 }
 0x255   : > { %v1127_v40 = vpop.eup %1126  ;;  %v752_v46 = vmul.f32 %v1125_v38, %v735_v39 }
 0x256   : > { %v1129_v41 = vpop.eup %1128  ;;  %v756_v50 = vmul.f32 %v1127_v40, %v745_v49 }
 0x257   : > { %v1131_v43 = vpop.eup %1130  ;;  %v753_v51 = vmul.f32 %v1129_v41, %v735_v39 }
 0x258   : > { %v1133_v44 = vpop.eup %1132  ;;  %v757_v56 = vmul.f32 %v1131_v43, %v745_v49 }
 0x259   : > { %v1135_v45 = vpop.eup %1134  ;;  %v754_v47 = vmul.f32 %v1133_v44, %v740_v42 }
 0x25a   : > { %v1137_v48 = vpop.eup %1136  ;;  %v758_v57 = vmul.f32 %v1135_v45, %v750_v55 }
 0x25b   : > { %v760_v52 = vadd.f32 %v754_v47, %v752_v46  ;;  %v755_v53 = vmul.f32 %v1137_v48, %v740_v42  ;;  %v1139_v54 = vpop.eup %1138 }
 0x25c   : > { %v759_v61 = vmul.f32 %v1139_v54, %v750_v55 }
 0x25d   : > { %v761_v58 = vadd.f32 %v760_v52, %v756_v50  ;;  %v769_v59 = vadd.f32 %v755_v53, %v753_v51 }
 0x25f   : > { %v762_v60 = vadd.f32 %v761_v58, %v758_v57  ;;  %v770_v62 = vadd.f32 %v769_v59, %v757_v56 }
 0x261   : > { %v763_v63 = vrot.slane %v762_v60, 4  ;;  %v771_v0 = vadd.f32 %v770_v62, %v759_v61 }
 0x263   : > { %v764_v1 = vadd.f32 %v763_v63, %v762_v60  ;;  %v772_v2 = vrot.slane %v771_v0, 4 }
 0x265   : > { %v765_v3 = vrot.slane %v764_v1, 2  ;;  %v773_v4 = vadd.f32 %v772_v2, %v771_v0 }
 0x267   : > { %v766_v5 = vadd.f32 %v765_v3, %v764_v1  ;;  %v774_v6 = vrot.slane %v773_v4, 2 }
 0x269   : > { %v767_v10 = vrot.slane %v766_v5, 1  ;;  %v775_v11 = vadd.f32 %v774_v6, %v773_v4 }
 0x26b   : > { %v768_v13 = vadd.f32 %v767_v10, %v766_v5  ;;  %v776_v14 = vrot.slane %v775_v11, 1 }
 0x26d   : > { %v780_v17 = vadd.f32 %v779_v12, %v768_v13  ;;  %v777_v18 = vadd.f32 %v776_v14, %v775_v11 }
 0x26f   : > { %v781_v19 = vadd.f32 %v779_v12, %v777_v18 }
 0x271   : > { %v784_v21 = vcombine.low %v780_v17, %v781_v19 }
 0x273   : > { %v791_v22 = vrot.slane %v784_v21, %v790_v20 }
 0x275   : > { %v798_v23 = vrot.slane %v791_v22, %v790_v20 }
 0x277   : > { %804 = vst.msk [vmem:[%s1389_s22] sm:$0x3] %vm802_vm2, %v798_v23 }
 0x278 PF: > { %s974_s13 = sshll.u32 %s1230_s27, 5  ;;  %s820_s15 = sshll.u32 %s1389_s22, 4  ;;  %s821_s15 = int_to_ptr.vmem [resolvable:$true] %s820_s15 }
 0x279   : > { %s1503_s21 = scalar_lea.hbm %s1565_s6, %s974_s13  ;;  %s1579_s18 = sand.u32 1, %s1218_s24  }
 0x27a   : > { %s806_s0 = scalar_lea.sflag [#allocation6], %s1579_s18  ;;  %s1140_s1 = scalar_lea.vmem %s821_s15, 32 }
 0x27b   : > { %p1141_p7 = scmp.ne.s32.totalorder %s821_s15, %s1140_s1  ;;  %s1256_s10 = smov [#allocation5]  }
 0x27c   : > { %s1144_s12 = sshll.u32 %s1256_s10, 4  ;;  %s1145_s12 = int_to_ptr.vmem [resolvable:$false] %s1144_s12 }
 0x27d   : > { %p1142_p9 = pnand %p1141_p7, %p1358_p6  ;;  %s1146_s11 = scalar_lea.vmem %s1145_s12, 64 }
 0x27e   : > { %p1147_p11 = scmp.lt.s32.totalorder %s821_s15, %s1145_s12  ;;  %p1148_p12 = scmp.lt.s32.totalorder %s1146_s11, %s1140_s1 }
 0x27f   : > { %p1143_p10 = pneg %p1142_p9 }
 0x280   : > { %p1149_p13 = por %p1148_p12, %p1147_p11 }
 0x282   : > { %p1150_p0 = pnand %p1149_p13, %p1143_p10 }
 0x284   : > { %1153 = shalt.err (!%p1150_p0)
}
 0x285   : > { %s1154_s27 = scalar_lea.hbm %s1503_s21, 32  ;;  %s1158_s7 = scalar_lea.hbm %s1565_s6, 64 }
 0x286   : > { %p1155_p1 = scmp.ne.s32.totalorder %s1503_s21, %s1154_s27  ;;  %p1159_p4 = scmp.lt.u32.totalorder %s1503_s21, %s1565_s6 }
 0x287   : > { %p1160_p5 = scmp.lt.u32.totalorder %s1158_s7, %s1154_s27  ;;  %p1162_p9 = scmp.lt.u32.totalorder %s1154_s27, %s1503_s21 }
 0x288   : > { %p1156_p2 = pnand %p1155_p1, %p1358_p6 }
 0x289   : > { %p1161_p7 = por %p1160_p5, %p1159_p4 }
 0x28a   : > { %p1157_p3 = pneg %p1156_p2 }
 0x28b   : > { %p1163_p10 = por %p1162_p9, %p1161_p7 }
 0x28d   : > { %p1164_p11 = pnand %p1163_p10, %p1157_p3 }
 0x28f   : > { %1167 = shalt.err (!%p1164_p11)
}
 0x290   : > { %983 = dma.vmem_to_hbm [thread:$0]  (%p1358_p6), %s821_s15, 32, %s1503_s21, %s806_s0  }
 0x291 PF: > { %p989_p12 = scmp.ge.s32.totalorder %s1250_s5, 2  ;;  %s832_s9 = sand.u32 1, %s1214_s23  }
 0x292   : > { %s833_s13 = scalar_lea.sflag [#allocation6], %s832_s9 }
 0x293   : > { %p986_p13 = pnand %p989_p12, %p1368_p8 }
 0x295   : > { %1209 = dma.done.wait (!%p986_p13), %s833_s13, 32  }
 0x296   : > { %1211 = vsyncadd (!%p986_p13), %s833_s13, 4294967264  ;;  %s20_s5 = sadd.s32 1, %s1250_s5   ;;  %s1580_s28 = sld [smem:[#allocation8_spill]] }
 0x297   : > { %p17_p0 = scmp.ge.s32.totalorder %s20_s5, 10   ;;  %s1581_s14 = sld [smem:[#allocation9_spill]] }
 0x298   : > { %s1582_s19 = sld [smem:[#allocation10_spill]]  ;;  %s1583_s7 = sld [smem:[#allocation11_spill]] }
 0x299   : > { %s1584_s23 = smov %s1218_s24  ;;  %s1585_s24 = smov %s1222_s25 }
 0x29a   : > { %s1586_s25 = smov %s1376_s17  ;;  %s1587_s26 = smov %s1238_s29 }
 0x29b   : > { %s1588_s27 = smov %s1242_s30  ;;  %19 = sbr.rel (!%p17_p0) target bundleno = 10 (0xa), region = 99 }
 0x29d   : > { %s1589_s29 = smov %s1581_s14 }
 0x29e   : > { %s1590_s30 = smov %s1582_s19 }
 0x2a2   :  { %838 = vsyncpa [#allocation6], 1 }
 0x2a3   :  { %840 = vsyncpa [#allocation6 + $0x1], 1 }

</bundles_post_ra>
